<compile_context>
chip_gen: v7x
topology: tpu7x:2x2x1
jax: 0.10.0
libtpu: 0.0.40
codegen_flags: <defaults>
</compile_context>

<pallas_src>
import jax
import jax.numpy as jnp
from jax.experimental import pallas as pl
from jax.experimental.pallas import tpu as pltpu


# ---------------------------------------------------------------------------
# Kernels
# ---------------------------------------------------------------------------

def _pool_sum_kernel(x_ref, sum_ref):
    """x_ref: (Rt, Tx) tile of (rows=B*inp, spatial). sum_ref: (Rt, 1) f32 acc."""
    t = pl.program_id(1)                      # spatial (reduction) axis, last

    @pl.when(t == 0)
    def _():
        sum_ref[...] = jnp.zeros_like(sum_ref)

    # Accumulate partial row sums in f32 regardless of input dtype.
    sum_ref[...] += jnp.sum(x_ref[...].astype(jnp.float32), axis=-1,
                            keepdims=True)


def _gate_kernel(s_ref, z_ref, o_ref):
    """s_ref: (Rt, 1) per-row scale; z_ref/o_ref: (Rt, Tz) tiles."""
    o_ref[...] = (s_ref[...] * z_ref[...]).astype(o_ref.dtype)


# ---------------------------------------------------------------------------
# Tiling helpers
# ---------------------------------------------------------------------------

def _pick_tile(n, unit, max_tile):
    """Pad n up to a multiple of `unit`, then pick the largest tile that is a
    multiple of `unit`, divides the padded length, and is <= max_tile."""
    n_pad = ((n + unit - 1) // unit) * unit
    m = n_pad // unit
    best = 1
    d = 1
    while d * d <= m:
        if m % d == 0:
            for c in (d, m // d):
                if unit * c <= max_tile and c > best:
                    best = c
        d += 1
    return n_pad, unit * best


_VMEM_LIMIT = 32 * 1024 * 1024   # explicit; tiles are a few MiB, safe on all gens
_MAX_SPATIAL_TILE = 1024         # lanes per tile (multiple of 128)
_MAX_ROW_TILE = 256              # rows per tile (multiple of 8)


# ---------------------------------------------------------------------------
# Wrapper
# ---------------------------------------------------------------------------

def se_module_diff(x, z, w1, b1, w2, b2):
    """x: (B, inp, H, W), z: (B, oup, Hz, Wz). Returns sigmoid(SE(x)) * z."""
    B, inp, H, W = x.shape
    Bz, oup, Hz, Wz = z.shape
    assert B == Bz
    sq = w1.shape[0]
    HW, HWz = H * W, Hz * Wz

    # ---------------- stage 1: tiled global average pool (Pallas) -----------
    R = B * inp
    x2 = x.reshape(R, HW)
    HW_pad, Tx = _pick_tile(HW, 128, _MAX_SPATIAL_TILE)
    R_pad, Rt = _pick_tile(R, 8, _MAX_ROW_TILE)
    if (R_pad != R) or (HW_pad != HW):
        x2 = jnp.pad(x2, ((0, R_pad - R), (0, HW_pad - HW)))   # zero pad: sum-safe

    sums = pl.pallas_call(
        _pool_sum_kernel,
        out_shape=jax.ShapeDtypeStruct((R_pad, 1), jnp.float32),
        grid_spec=pltpu.PrefetchScalarGridSpec(
            num_scalar_prefetch=0,
            grid=(R_pad // Rt, HW_pad // Tx),
            in_specs=[pl.BlockSpec((Rt, Tx), lambda r, t: (r, t))],
            out_specs=pl.BlockSpec((Rt, 1), lambda r, t: (r, 0)),
        ),
        compiler_params=pltpu.CompilerParams(
            dimension_semantics=("parallel", "arbitrary"),
            vmem_limit_bytes=_VMEM_LIMIT),
    )(x2)

    pooled = sums[:R, 0].reshape(B, inp) * (1.0 / HW)            # (B, inp) f32

    # ---------------- stage 2: tiny FCs + activations (plain JAX) -----------
    # 1x1 convs on a (B, inp, 1, 1) tensor == small dense matmuls; O(B*inp*sq).
    h = pooled @ w1.astype(jnp.float32).T + b1.astype(jnp.float32)   # (B, sq)
    h = h * jax.nn.sigmoid(h)                                        # swish
    y = h @ w2.astype(jnp.float32).T + b2.astype(jnp.float32)        # (B, oup)
    s = jax.nn.sigmoid(y)                                            # (B, oup) f32

    # ---------------- stage 3: tiled channel-wise gating (Pallas) -----------
    Rz = B * oup
    z2 = z.reshape(Rz, HWz)
    HWz_pad, Tz = _pick_tile(HWz, 128, _MAX_SPATIAL_TILE)
    Rz_pad, Rtz = _pick_tile(Rz, 8, _MAX_ROW_TILE)
    if (Rz_pad != Rz) or (HWz_pad != HWz):
        z2 = jnp.pad(z2, ((0, Rz_pad - Rz), (0, HWz_pad - HWz)))
    s2 = s.reshape(Rz, 1)
    if Rz_pad != Rz:
        s2 = jnp.pad(s2, ((0, Rz_pad - Rz), (0, 0)))

    out2 = pl.pallas_call(
        _gate_kernel,
        out_shape=jax.ShapeDtypeStruct((Rz_pad, HWz_pad), z.dtype),
        grid_spec=pltpu.PrefetchScalarGridSpec(
            num_scalar_prefetch=0,
            grid=(Rz_pad // Rtz, HWz_pad // Tz),
            in_specs=[
                pl.BlockSpec((Rtz, 1), lambda r, t: (r, 0)),       # per-row scale
                pl.BlockSpec((Rtz, Tz), lambda r, t: (r, t)),      # z tile
            ],
            out_specs=pl.BlockSpec((Rtz, Tz), lambda r, t: (r, t)),
        ),
        compiler_params=pltpu.CompilerParams(
            dimension_semantics=("parallel", "parallel"),
            vmem_limit_bytes=_VMEM_LIMIT),
    )(s2, z2)

    return out2[:Rz, :HWz].reshape(B, oup, Hz, Wz)


# ---------------------------------------------------------------------------
# Params / reference / test
# ---------------------------------------------------------------------------

def init_params(key, inp, oup, se_ratio=4):
    """Matches reset_parameters(): weight ~ N(0, sqrt(2/(k*k*out_ch))), bias=0."""
    sq = max(1, int(inp / se_ratio))
    k1, k2 = jax.random.split(key)
    w1 = jax.random.normal(k1, (sq, inp), jnp.float32) * jnp.sqrt(2.0 / sq)
    b1 = jnp.zeros((sq,), jnp.float32)
    w2 = jax.random.normal(k2, (oup, sq), jnp.float32) * jnp.sqrt(2.0 / oup)
    b2 = jnp.zeros((oup,), jnp.float32)
    return w1, b1, w2, b2


def _reference(x, z, w1, b1, w2, b2):
    # pure-JAX reference of the PyTorch forward (Avg_size=1)
    pooled = jnp.mean(x, axis=(2, 3))                       # (B, inp)
    h = pooled @ w1.T + b1                                  # (B, sq)
    h = h * jax.nn.sigmoid(h)
    y = h @ w2.T + b2                                       # (B, oup)
    return jax.nn.sigmoid(y)[:, :, None, None] * z


if __name__ == "__main__":
    # TODO(synk): Avg_size != 1 path (bilinear upsample of the gate map) is not
    # implemented; default Avg_size=1 is reproduced exactly.
    key = jax.random.PRNGKey(0)
    kx, kz, kp = jax.random.split(key, 3)

    B, inp, oup, H, W = 2, 4, 4, 16, 16
    x = jax.random.normal(kx, (B, inp, H, W), jnp.float32)
    z = jax.random.normal(kz, (B, oup, H, W), jnp.float32)
    w1, b1, w2, b2 = init_params(kp, inp, oup)

    fn = jax.jit(se_module_diff)
    out = fn(x, z, w1, b1, w2, b2)
    out = jax.block_until_ready(out)

    ref = _reference(x, z, w1, b1, w2, b2)
    assert out.shape == ref.shape
    assert jnp.allclose(out, ref, atol=1e-5, rtol=1e-5)
    print("KERNEL_OK")
</pallas_src>

<mosaic_0001>
module attributes {stable_mosaic.version = 11 : i64} {
  func.func @_pool_sum_kernel(%arg0: i32, %arg1: i32, %arg2: memref<8x256xf32, #tpu.memory_space<vmem>>, %arg3: memref<8x1xf32, #tpu.memory_space<vmem>>) attributes {dimension_semantics = [#tpu.dimension_semantics<parallel>, #tpu.dimension_semantics<arbitrary>], iteration_bounds = array<i64: 1, 1>, scalar_prefetch = 0 : i64, scratch_operands = 0 : i64, tpu.core_type = #tpu.core_type<tc>, window_params = [{transform_indices = @transform_0, window_bounds = array<i64: 8, 256>}, {transform_indices = @transform_1, window_bounds = array<i64: 8, 1>}]} {
    %c0_i32 = arith.constant 0 : i32
    %0 = arith.cmpi eq, %arg1, %c0_i32 : i32
    %1 = arith.extui %0 : i1 to i32
    %c0_i32_0 = arith.constant 0 : i32
    %2 = arith.cmpi ne, %1, %c0_i32_0 : i32
    scf.if %2 {
      %cst_6 = arith.constant 0.000000e+00 : f32
      %9 = vector.broadcast %cst_6 : f32 to vector<8x1xf32>
      %c0_7 = arith.constant 0 : index
      %c0_8 = arith.constant 0 : index
      %10 = vector.load %arg3[%c0_7, %c0_8] : memref<8x1xf32, #tpu.memory_space<vmem>>, vector<8x1xf32>
      tpu.vector_store %arg3[%c0_7, %c0_8], %9 {strides = array<i32>} : memref<8x1xf32, #tpu.memory_space<vmem>>, vector<8x1xf32>,
    } else {
    }
    %c0 = arith.constant 0 : index
    %c0_1 = arith.constant 0 : index
    %3 = vector.load %arg3[%c0, %c0_1] : memref<8x1xf32, #tpu.memory_space<vmem>>, vector<8x1xf32>
    %c0_2 = arith.constant 0 : index
    %c0_3 = arith.constant 0 : index
    %4 = vector.load %arg2[%c0_2, %c0_3] : memref<8x256xf32, #tpu.memory_space<vmem>>, vector<8x256xf32>
    %cst = arith.constant dense<0.000000e+00> : vector<8xf32>
    %5 = vector.multi_reduction <add>, %4, %cst [1] : vector<8x256xf32> to vector<8xf32>
    %6 = vector.shape_cast %5 : vector<8xf32> to vector<8x1xf32>
    %7 = arith.addf %3, %6 : vector<8x1xf32>
    %c0_4 = arith.constant 0 : index
    %c0_5 = arith.constant 0 : index
    %8 = vector.load %arg3[%c0_4, %c0_5] : memref<8x1xf32, #tpu.memory_space<vmem>>, vector<8x1xf32>
    tpu.vector_store %arg3[%c0_4, %c0_5], %7 {strides = array<i32>} : memref<8x1xf32, #tpu.memory_space<vmem>>, vector<8x1xf32>,
    return
  }
  func.func @transform_0(%arg0: i32, %arg1: i32) -> (i32, i32) {
    %c0_i32 = arith.constant 0 : i32
    return %arg0, %arg1 : i32, i32
  }
  func.func @transform_1(%arg0: i32, %arg1: i32) -> (i32, i32) {
    %c0_i32 = arith.constant 0 : i32
    %c0_i32_0 = arith.constant 0 : i32
    return %arg0, %c0_i32 : i32, i32
  }
}

module attributes {stable_mosaic.version = 11 : i64} {
  func.func @_gate_kernel(%arg0: i32, %arg1: i32, %arg2: memref<8x1xf32, #tpu.memory_space<vmem>>, %arg3: memref<8x256xf32, #tpu.memory_space<vmem>>, %arg4: memref<8x256xf32, #tpu.memory_space<vmem>>) attributes {dimension_semantics = [#tpu.dimension_semantics<parallel>, #tpu.dimension_semantics<parallel>], iteration_bounds = array<i64: 1, 1>, scalar_prefetch = 0 : i64, scratch_operands = 0 : i64, tpu.core_type = #tpu.core_type<tc>, window_params = [{transform_indices = @transform_0, window_bounds = array<i64: 8, 1>}, {transform_indices = @transform_1, window_bounds = array<i64: 8, 256>}, {transform_indices = @transform_2, window_bounds = array<i64: 8, 256>}]} {
    %c0 = arith.constant 0 : index
    %c0_0 = arith.constant 0 : index
    %0 = vector.load %arg2[%c0, %c0_0] : memref<8x1xf32, #tpu.memory_space<vmem>>, vector<8x1xf32>
    %c0_1 = arith.constant 0 : index
    %c0_2 = arith.constant 0 : index
    %1 = vector.load %arg3[%c0_1, %c0_2] : memref<8x256xf32, #tpu.memory_space<vmem>>, vector<8x256xf32>
    %2 = vector.broadcast %0 : vector<8x1xf32> to vector<8x256xf32>
    %3 = arith.mulf %2, %1 : vector<8x256xf32>
    %c0_3 = arith.constant 0 : index
    %c0_4 = arith.constant 0 : index
    %4 = vector.load %arg4[%c0_3, %c0_4] : memref<8x256xf32, #tpu.memory_space<vmem>>, vector<8x256xf32>
    tpu.vector_store %arg4[%c0_3, %c0_4], %3 {strides = array<i32>} : memref<8x256xf32, #tpu.memory_space<vmem>>, vector<8x256xf32>,
    return
  }
  func.func @transform_0(%arg0: i32, %arg1: i32) -> (i32, i32) {
    %c0_i32 = arith.constant 0 : i32
    %c0_i32_0 = arith.constant 0 : i32
    return %arg0, %c0_i32 : i32, i32
  }
  func.func @transform_1(%arg0: i32, %arg1: i32) -> (i32, i32) {
    %c0_i32 = arith.constant 0 : i32
    return %arg0, %arg1 : i32, i32
  }
  func.func @transform_2(%arg0: i32, %arg1: i32) -> (i32, i32) {
    %c0_i32 = arith.constant 0 : i32
    return %arg0, %arg1 : i32, i32
  }
}

</mosaic_0001>

<bundles_post_ra>
// kernel: se_module_diff.2
= control target key start
LH: loop header
LB: loop body
LE: loop exit
PB: predicated region body
PF: predicated region fallthrough
CT: control target
= control target key end

     0   :  { %vm12_vm0 = vcmask 7168   ;;  %v28_v2 = vmov 0.0   ;;  %s54_s0 = inlined_call_operand.vmem [shape: f32[8,256], index: 0, kind: input, shape index: {}]   ;;  %s55_s1 = inlined_call_operand.vmem [shape: f32[8,1], index: 1, kind: output, shape index: {}]  }
   0x1   :  { %v15_v0 = vld [vmem:[%s54_s0] sm:$0xff]  ;;  %v16_v1 = vld [vmem:[%s54_s0 + $0x8] sm:$0xff]  ;;  %13 = vst.msk [vmem:[%s55_s1] sm:$0xff] %vm12_vm0, %v28_v2 }
   0x2   :  { %v17_v3 = vadd.f32 %v16_v1, %v15_v0 }
   0x4   :  { %18 = vadd.xlane.f32.xlu0 %v17_v3 }
   0x8   :  { %v14_v4 = vld [vmem:[%s55_s1] sm:$0xff] }
  0x91   :  { %v19_v5 = vpop.xlane.xlu0 %18 }
  0x92   :  { %v20_v6 = vadd.f32 %v19_v5, %v14_v4 }
  0x94   :  { %22 = vst.msk [vmem:[%s55_s1] sm:$0xff] %vm12_vm0, %v20_v6 }

// kernel: se_module_diff.3
= control target key start
LH: loop header
LB: loop body
LE: loop exit
PB: predicated region body
PF: predicated region fallthrough
CT: control target
= control target key end

     0   :  { %v29_v0 = vmov 0   ;;  %s60_s0 = inlined_call_operand.vmem [shape: f32[8,1], index: 0, kind: input, shape index: {}]   ;;  %s61_s1 = inlined_call_operand.vmem [shape: f32[8,256], index: 1, kind: input, shape index: {}]   ;;  %s62_s2 = inlined_call_operand.vmem [shape: f32[8,256], index: 2, kind: output, shape index: {}]  }
   0x1   :  { %28 = vset.pattern.permute.xlu0 %v29_v0  ;;  %v11_v1 = vld [vmem:[%s60_s0] sm:$0xff]  ;;  %v13_v3 = vld [vmem:[%s61_s1 + $0x8] sm:$0xff] }
   0x2   :  { %16 = vperm.xlu0 %28, %v11_v1   ;;  %v12_v2 = vld [vmem:[%s61_s1] sm:$0xff] }
  0x81   :  { %v17_v4 = vpop.permute.xlu0 %16 }
  0x82   :  { %v19_v5 = vmul.f32 %v17_v4, %v12_v2  ;;  %v20_v6 = vmul.f32 %v17_v4, %v13_v3 }
  0x84   :  { %21 = vst [vmem:[%s62_s2] sm:$0xff] %v19_v5  ;;  %22 = vst [vmem:[%s62_s2 + $0x8] sm:$0xff] %v20_v6 }

</bundles_post_ra>
